<compile_context>
chip_gen: v6e
topology: v6e:2x2x1
jax: 0.10.0
libtpu: 0.0.40
codegen_flags: <defaults>
</compile_context>

<pallas_src>
import functools

import jax
import jax.numpy as jnp
from jax.experimental import pallas as pl
from jax.experimental.pallas import tpu as pltpu

BN_EPS = 1e-5

# MXU operand dtype.  Kept f32 for bit-faithfulness to the f32 PyTorch reference;
# set to jnp.bfloat16 on v6e/v7x for ~2-4x MXU throughput (accumulation stays f32
# via preferred_element_type).
MATMUL_DTYPE = jnp.float32

_VMEM_LIMIT_CACHE = None


def _vmem_limit_bytes():
    """Generation-dependent VMEM budget: ~100 MiB on 128-MiB parts (v5e/v6e),
    <=48 MiB on 64-MiB parts (v7x); safe default if the query is unavailable."""
    global _VMEM_LIMIT_CACHE
    if _VMEM_LIMIT_CACHE is None:
        limit = 48 * 1024 * 1024
        try:
            cap = int(pltpu.get_tpu_info().vmem_capacity_bytes)
            if cap >= (96 << 20):          # v5e / v6e (128 MiB physical)
                limit = 100 << 20
            elif cap > 0:                  # v7x (64 MiB physical)
                limit = min(max(cap - (16 << 20), 32 << 20), 48 << 20)
        except Exception:                  # interpret mode / CPU AOT
            pass
        _VMEM_LIMIT_CACHE = limit
    return _VMEM_LIMIT_CACHE


# ----------------------------------------------------------------------------
# tiling helpers
# ----------------------------------------------------------------------------
def _pick_tile(total, target, multiple=1):
    """Largest divisor of `total` that is <= max(target, multiple) and a multiple
    of `multiple`; falls back to `total` (single block) if none exists."""
    best = 0
    limit = min(total, max(target, multiple))
    t = multiple
    while t <= limit:
        if total % t == 0:
            best = t
        t += multiple
    return best if best > 0 else total


def _pick_cout_tile(cout):
    """MXU-friendly Cout tile (256 native on v6e/v7x, 128 on v5e); no tiling for
    small channel counts so the output block stays a single lane-dense slab."""
    if cout <= 256:
        return cout
    for t in (256, 128):
        if cout % t == 0:
            return t
    return cout


# ----------------------------------------------------------------------------
# Pallas kernel 1: BatchNorm batch statistics (lane-dense tiled reduction)
# ----------------------------------------------------------------------------
def _bn_stats_kernel(x_ref, o_ref, acc_ref, *, inv_m, w_fold, c):
    i = pl.program_id(0)

    @pl.when(i == 0)
    def _():
        acc_ref[...] = jnp.zeros_like(acc_ref)

    xb = x_ref[...].astype(jnp.float32)                    # (tm, W*C), lane-dense
    acc_ref[0:1, :] += jnp.sum(xb, axis=0, keepdims=True)
    acc_ref[1:2, :] += jnp.sum(xb * xb, axis=0, keepdims=True)

    @pl.when(i == pl.num_programs(0) - 1)
    def _():
        # finish the per-channel reduction over the W groups folded into lanes
        sm = acc_ref[0:1, 0:c]
        sq = acc_ref[1:2, 0:c]
        for k in range(1, w_fold):
            sm = sm + acc_ref[0:1, k * c:(k + 1) * c]
            sq = sq + acc_ref[1:2, k * c:(k + 1) * c]
        mean = sm * inv_m
        var = jnp.maximum(sq * inv_m - mean * mean, 0.0)   # clamp: cancellation guard
        o_ref[0:1, :] = mean
        o_ref[1:2, :] = var


def batchnorm_stats(x):
    """Per-channel (mean, biased var) over (N, H, W) for NHWC `x` -> (2, C) f32.
    Reduces over a lane-dense (N*H, W*C) view of the activation."""
    N, H, W, C = x.shape
    M = N * H
    lane = W * C
    xf = x.reshape(M, lane)                                 # free, contiguous view
    target = max(8, min(M, (4 << 20) // max(1, lane * x.dtype.itemsize)))
    tm = _pick_tile(M, target, 8)
    kernel = functools.partial(
        _bn_stats_kernel,
        inv_m=1.0 / float(N * H * W),                       # python float: not captured
        w_fold=W, c=C)
    return pl.pallas_call(
        kernel,
        out_shape=jax.ShapeDtypeStruct((2, C), jnp.float32),
        grid=(M // tm,),
        in_specs=[pl.BlockSpec((tm, lane), lambda i: (i, 0))],
        out_specs=pl.BlockSpec((2, C), lambda i: (0, 0)),
        scratch_shapes=[pltpu.VMEM((2, lane), jnp.float32)],
        compiler_params=pltpu.CompilerParams(
            dimension_semantics=("arbitrary",),
            vmem_limit_bytes=_vmem_limit_bytes()),
        cost_estimate=pl.CostEstimate(
            flops=3 * M * lane, transcendentals=0,
            bytes_accessed=M * lane * x.dtype.itemsize + 2 * C * 4),
    )(xf)


# ----------------------------------------------------------------------------
# in-kernel helpers (concat/stack based: no jnp.pad / jnp.repeat)
# ----------------------------------------------------------------------------
def _up2(v):
    """2x nearest-neighbour upsample of (H, W, C)."""
    H, W, C = v.shape
    v = jnp.stack([v, v], axis=2).reshape(H, 2 * W, C)
    v = jnp.stack([v, v], axis=1).reshape(2 * H, 2 * W, C)
    return v


def _zero_pad_hw(v, p):
    """Zero-pad the two spatial dims of (H, W, C) by p."""
    if p == 0:
        return v
    H, W, C = v.shape
    zr = jnp.zeros((p, W, C), v.dtype)
    v = jnp.concatenate([zr, v, zr], axis=0)
    zc = jnp.zeros((H + 2 * p, p, C), v.dtype)
    return jnp.concatenate([zc, v, zc], axis=1)


# ----------------------------------------------------------------------------
# Pallas kernel 2: conv (stride 1) with fused norm+ReLU prologue, phase-decomposed
#                  2x upsample, fused residual add and fused BN-stats epilogue.
# ----------------------------------------------------------------------------
def _make_conv_kernel(*, KH, KW, pad, phase_up, Ho, Wo, Cin, tc, batch,
                      has_norm, has_skip, skip_up, has_stats, flat_out):
    inv_m = 1.0 / float(batch * Ho * Wo)                    # python float

    def kernel(*refs):
        refs = list(refs)
        x_ref = refs.pop(0)
        w_ref = refs.pop(0)
        b_ref = refs.pop(0)
        if has_norm:
            sin_ref = refs.pop(0)
            g_ref = refs.pop(0)
            bt_ref = refs.pop(0)
        skip_ref = refs.pop(0) if has_skip else None
        o_ref = refs.pop(0)
        st_ref = refs.pop(0) if has_stats else None

        x = x_ref[0].astype(jnp.float32)                    # (H, W, Cin)
        H, W = x.shape[0], x.shape[1]

        # ---- fused ConditionalNorm (affine-free BN + per-sample gamma/beta) + ReLU
        if has_norm:
            mean = sin_ref[0:1, :]
            var = sin_ref[1:2, :]
            inv = jax.lax.rsqrt(var + BN_EPS)
            g = g_ref[0].astype(jnp.float32)                # (1, Cin)
            b = bt_ref[0].astype(jnp.float32)
            scale = (g * inv).reshape(1, 1, Cin)
            shift = (b - g * mean * inv).reshape(1, 1, Cin)
            x = jnp.maximum(x * scale + shift, 0.0)

        # ---- convolution as im2col MXU matmuls (f32 accumulation)
        if phase_up:
            # phase-decomposed "3x3/pad1 conv after 2x nearest upsample": each of
            # the 4 output phases is a 2x2 conv on the LOW-res input with weights
            # pre-folded in the wrapper -> no 4x intermediate, 16/36 of the MACs.
            xp = _zero_pad_hw(x, 1)
            starts = {0: (0, 1), 1: (1, 2)}                 # parity -> padded starts
            phases = []
            for pi in (0, 1):
                for pj in (0, 1):
                    patches = [xp[r:r + H, c:c + W, :]
                               for r in starts[pi] for c in starts[pj]]
                    pm = jnp.concatenate(patches, axis=-1)              # (H, W, 4*Cin)
                    pm = pm.reshape(H * W, 4 * Cin).astype(MATMUL_DTYPE)
                    ph = pi * 2 + pj
                    phases.append(
                        jnp.dot(pm, w_ref[ph], preferred_element_type=jnp.float32)
                        .reshape(H, W, tc))
            p00, p01, p10, p11 = phases
            r0 = jnp.stack([p00, p01], axis=2).reshape(H, 2 * W, tc)
            r1 = jnp.stack([p10, p11], axis=2).reshape(H, 2 * W, tc)
            out = jnp.stack([r0, r1], axis=1).reshape(Ho, Wo, tc)
        else:
            xp = _zero_pad_hw(x, pad)
            patches = [xp[kh:kh + Ho, kw:kw + Wo, :]
                       for kh in range(KH) for kw in range(KW)]
            pm = patches[0] if len(patches) == 1 else jnp.concatenate(patches, axis=-1)
            pm = pm.reshape(Ho * Wo, KH * KW * Cin).astype(MATMUL_DTYPE)
            out = jnp.dot(pm, w_ref[...],
                          preferred_element_type=jnp.float32).reshape(Ho, Wo, tc)

        out = out + b_ref[...].reshape(1, 1, tc).astype(jnp.float32)

        # ---- fused residual add (skip is 2x nearest-upsampled if at low res)
        if has_skip:
            s = skip_ref[0].astype(jnp.float32)
            if skip_up:
                s = _up2(s)
            out = out + s

        # ---- fused BatchNorm batch statistics of this conv's own output
        if has_stats:
            n = pl.program_id(1)
            flat = out.reshape(Ho * Wo, tc)
            csum = jnp.sum(flat, axis=0, keepdims=True)     # (1, tc)
            csq = jnp.sum(flat * flat, axis=0, keepdims=True)

            @pl.when(n == 0)
            def _():
                st_ref[...] = jnp.zeros_like(st_ref)

            st_ref[0:1, :] += csum
            st_ref[1:2, :] += csq

            @pl.when(n == pl.num_programs(1) - 1)
            def _():
                mean_c = st_ref[0:1, :] * inv_m
                var_c = jnp.maximum(st_ref[1:2, :] * inv_m - mean_c * mean_c, 0.0)
                st_ref[0:1, :] = mean_c
                st_ref[1:2, :] = var_c

        # ---- store (W folded into the lane axis when Cout is not lane-dense)
        if flat_out:
            o_ref[...] = out.reshape(1, Ho, Wo * tc).astype(o_ref.dtype)
        else:
            o_ref[...] = out.reshape(1, Ho, Wo, tc).astype(o_ref.dtype)

    return kernel


def _phase_weights(w_pt):
    """(Cout, Cin, 3, 3) -> (4, 4*Cin, Cout): per-phase effective 2x2 kernels for
    'conv3x3(pad1) applied after 2x nearest upsample', evaluated on the low-res
    grid (taps that hit the same low-res pixel are pre-summed)."""
    Wt = jnp.transpose(w_pt, (2, 3, 1, 0))                  # (3, 3, Cin, Cout)
    groups = {0: ((0,), (1, 2)),                            # parity 0: offsets (-1, 0)
              1: ((0, 1), (2,))}                            # parity 1: offsets (0, +1)
    phases = []
    for pi in (0, 1):
        rg = groups[pi]
        for pj in (0, 1):
            cg = groups[pj]
            blocks = []
            for khs in rg:
                for kws in cg:
                    acc = 0.0
                    for kh in khs:
                        for kw in kws:
                            acc = acc + Wt[kh, kw]
                    blocks.append(acc)                      # (Cin, Cout)
            phases.append(jnp.concatenate(blocks, axis=0))  # (4*Cin, Cout)
    return jnp.stack(phases, axis=0)                        # (4, 4*Cin, Cout)


def conv2d(x, w_pt, bias, *, padding, upsample_input=False, norm=None,
           skip=None, compute_stats=False):
    """Stride-1 conv on NHWC `x` with PyTorch-layout weight (Cout, Cin, KH, KW).

    Optional fusions:
      norm=(stats, gamma, beta): ConditionalNorm + ReLU prologue on the input tile,
      upsample_input=True      : phase-decomposed 2x nearest upsample (3x3/pad1),
      skip=<NHWC tensor>       : residual add (2x-upsampled if at half resolution),
      compute_stats=True       : also return (mean, var) of this conv's output.
    """
    N, H, W, Cin = x.shape
    Cout, Cin_w, KH, KW = w_pt.shape
    assert Cin_w == Cin
    if upsample_input:
        assert (KH, KW, padding) == (3, 3, 1), "phase decomposition assumes 3x3/pad1"
        Ho, Wo = 2 * H, 2 * W
        w = _phase_weights(w_pt).astype(MATMUL_DTYPE)       # (4, 4*Cin, Cout)
    else:
        Ho = H + 2 * padding - KH + 1
        Wo = W + 2 * padding - KW + 1
        w = jnp.transpose(w_pt, (2, 3, 1, 0)).reshape(KH * KW * Cin, Cout)
        w = w.astype(MATMUL_DTYPE)
    b2 = bias.reshape(1, Cout).astype(jnp.float32)

    tc = _pick_cout_tile(Cout)
    J = Cout // tc
    flat_out = (tc == Cout) and (Cout % 128 != 0)           # lane-dense store for tiny C

    in_specs = [pl.BlockSpec((1, H, W, Cin), lambda j, n: (n, 0, 0, 0))]
    args = [x]
    if upsample_input:
        in_specs.append(pl.BlockSpec((4, 4 * Cin, tc), lambda j, n: (0, 0, j)))
    else:
        in_specs.append(pl.BlockSpec((KH * KW * Cin, tc), lambda j, n: (0, j)))
    args.append(w)
    in_specs.append(pl.BlockSpec((1, tc), lambda j, n: (0, j)))
    args.append(b2)

    has_norm = norm is not None
    if has_norm:
        stats_in, gamma, beta = norm
        in_specs += [
            pl.BlockSpec((2, Cin), lambda j, n: (0, 0)),
            pl.BlockSpec((1, 1, Cin), lambda j, n: (n, 0, 0)),
            pl.BlockSpec((1, 1, Cin), lambda j, n: (n, 0, 0)),
        ]
        args += [stats_in.astype(jnp.float32),
                 gamma.reshape(N, 1, Cin).astype(jnp.float32),
                 beta.reshape(N, 1, Cin).astype(jnp.float32)]

    has_skip = skip is not None
    skip_up = False
    if has_skip:
        _, Hs, Ws, Cs = skip.shape
        assert Cs == Cout
        assert (Hs, Ws) in ((Ho, Wo), (Ho // 2, Wo // 2))
        skip_up = (Hs != Ho)
        in_specs.append(pl.BlockSpec((1, Hs, Ws, tc), lambda j, n: (n, 0, 0, j)))
        args.append(skip)

    if flat_out:
        out_shapes = [jax.ShapeDtypeStruct((N, Ho, Wo * Cout), x.dtype)]
        out_specs = [pl.BlockSpec((1, Ho, Wo * tc), lambda j, n: (n, 0, 0))]
    else:
        out_shapes = [jax.ShapeDtypeStruct((N, Ho, Wo, Cout), x.dtype)]
        out_specs = [pl.BlockSpec((1, Ho, Wo, tc), lambda j, n: (n, 0, 0, j))]
    if compute_stats:
        out_shapes.append(jax.ShapeDtypeStruct((2, Cout), jnp.float32))
        out_specs.append(pl.BlockSpec((2, tc), lambda j, n: (0, j)))

    kernel = _make_conv_kernel(
        KH=KH, KW=KW, pad=padding, phase_up=upsample_input, Ho=Ho, Wo=Wo,
        Cin=Cin, tc=tc, batch=N, has_norm=has_norm, has_skip=has_skip,
        skip_up=skip_up, has_stats=compute_stats, flat_out=flat_out)

    k_eff = 4 if upsample_input else KH * KW
    flops = 2 * N * Ho * Wo * k_eff * Cin * Cout
    bytes_acc = int(x.size) * x.dtype.itemsize + int(w.size) * w.dtype.itemsize \
        + N * Ho * Wo * Cout * x.dtype.itemsize \
        + (int(skip.size) * skip.dtype.itemsize if has_skip else 0)

    outs = pl.pallas_call(
        kernel,
        out_shape=tuple(out_shapes) if len(out_shapes) > 1 else out_shapes[0],
        grid=(J, N),                                        # batch axis innermost
        in_specs=in_specs,
        out_specs=tuple(out_specs) if len(out_specs) > 1 else out_specs[0],
        compiler_params=pltpu.CompilerParams(
            dimension_semantics=(
                "parallel", "arbitrary" if compute_stats else "parallel"),
            vmem_limit_bytes=_vmem_limit_bytes()),
        cost_estimate=pl.CostEstimate(flops=flops, transcendentals=0,
                                      bytes_accessed=bytes_acc),
    )(*args)

    if compute_stats:
        out, stats = outs
    else:
        out, stats = outs, None
    if flat_out:
        out = out.reshape(N, Ho, Wo, Cout)                  # free, contiguous view
    return (out, stats) if compute_stats else out


# ----------------------------------------------------------------------------
# Plain-JAX glue (parameter preprocessing, tiny embed linear)
# ----------------------------------------------------------------------------
def spectral_norm_weight(w_pt, key, n_iter=1):
    """One power-iteration spectral normalization of a conv weight."""
    cout = w_pt.shape[0]
    w_mat = w_pt.reshape(cout, -1)
    u = jax.random.normal(key, (cout,), dtype=w_pt.dtype)
    u = u / (jnp.linalg.norm(u) + 1e-12)
    v = None
    for _ in range(n_iter):
        v = w_mat.T @ u
        v = v / (jnp.linalg.norm(v) + 1e-12)
        u = w_mat @ v
        u = u / (jnp.linalg.norm(u) + 1e-12)
    sigma = u @ (w_mat @ v)
    return w_pt / sigma


def cond_embed(condition, n_channel, bias):
    """ConditionalNorm.embed: Linear(148 -> 2*C) with the module's hard-coded
    weight init (first C input columns = 1, remaining columns = 0)."""
    n_cond = condition.shape[1]
    w = jnp.concatenate(
        [jnp.ones((2 * n_channel, n_channel), jnp.float32),
         jnp.zeros((2 * n_channel, n_cond - n_channel), jnp.float32)], axis=1)
    out = condition @ w.T + bias
    return out[:, :n_channel], out[:, n_channel:]


# ----------------------------------------------------------------------------
# GBlock forward (bn=True, upsample=True, downsample=False, 3x3/pad1/stride1, ReLU)
# ----------------------------------------------------------------------------
def gblock_forward(params, x_nchw, condition):
    x = jnp.transpose(x_nchw, (0, 2, 3, 1))                 # NCHW -> NHWC
    in_ch = x.shape[-1]
    out_ch = params["conv0_w_sn"].shape[0]

    # BN batch statistics of the block input (standalone lane-dense reduction)
    stats0 = batchnorm_stats(x)
    g0, b0 = cond_embed(condition, in_ch, params["hbn0_bias"])

    # conv0: fused HyperBN+ReLU prologue, phase-decomposed 2x upsample,
    #        fused BN-stats epilogue for its own output (feeds HyperBN_1).
    h, stats1 = conv2d(x, params["conv0_w_sn"], params["conv0_b"],
                       padding=1, upsample_input=True,
                       norm=(stats0, g0, b0), compute_stats=True)

    g1, b1 = cond_embed(condition, out_ch, params["hbn1_bias"])

    # skip projection at LOW resolution (1x1 conv commutes with nearest upsample);
    # its 2x upsample + the residual add are fused into conv1's epilogue.
    skip_small = conv2d(x, params["convsc_w_sn"], params["convsc_b"], padding=0)

    # conv1: fused HyperBN_1+ReLU prologue, fused skip upsample + residual add.
    y = conv2d(h, params["conv1_w_sn"], params["conv1_b"],
               padding=1, norm=(stats1, g1, b1), skip=skip_small)

    return jnp.transpose(y, (0, 3, 1, 2))                   # NHWC -> NCHW


# ----------------------------------------------------------------------------
# Pure-JAX reference (numerical sanity check)
# ----------------------------------------------------------------------------
def _reference_forward(params, x_nchw, condition):
    x = x_nchw.astype(jnp.float32)

    def bn(v):
        m = jnp.mean(v, axis=(0, 2, 3), keepdims=True)
        var = jnp.mean((v - m) ** 2, axis=(0, 2, 3), keepdims=True)
        return (v - m) / jnp.sqrt(var + BN_EPS)

    def cn(v, bias):
        c = v.shape[1]
        g, b = cond_embed(condition, c, bias)
        return g[:, :, None, None] * bn(v) + b[:, :, None, None]

    def up(v):
        return jnp.repeat(jnp.repeat(v, 2, axis=2), 2, axis=3)

    def conv(v, w, b, pad):
        out = jax.lax.conv_general_dilated(
            v, w, (1, 1), [(pad, pad), (pad, pad)],
            dimension_numbers=("NCHW", "OIHW", "NCHW"))
        return out + b[None, :, None, None]

    h = jax.nn.relu(cn(x, params["hbn0_bias"]))
    h = conv(up(h), params["conv0_w_sn"], params["conv0_b"], 1)
    h = jax.nn.relu(cn(h, params["hbn1_bias"]))
    h = conv(h, params["conv1_w_sn"], params["conv1_b"], 1)
    skip = conv(up(x), params["convsc_w_sn"], params["convsc_b"], 0)
    return h + skip


# ----------------------------------------------------------------------------
# Parameters
# ----------------------------------------------------------------------------
def init_params(key, in_channel, out_channel):
    ks = jax.random.split(key, 10)
    conv0_w = 0.1 * jax.random.normal(ks[0], (out_channel, in_channel, 3, 3), jnp.float32)
    conv0_b = 0.1 * jax.random.normal(ks[1], (out_channel,), jnp.float32)
    conv1_w = 0.1 * jax.random.normal(ks[2], (out_channel, out_channel, 3, 3), jnp.float32)
    conv1_b = 0.1 * jax.random.normal(ks[3], (out_channel,), jnp.float32)
    convsc_w = 0.1 * jax.random.normal(ks[4], (out_channel, in_channel, 1, 1), jnp.float32)
    convsc_b = 0.1 * jax.random.normal(ks[5], (out_channel,), jnp.float32)
    return {
        "conv0_w_sn": spectral_norm_weight(conv0_w, ks[6]),
        "conv0_b": conv0_b,
        "conv1_w_sn": spectral_norm_weight(conv1_w, ks[7]),
        "conv1_b": conv1_b,
        "convsc_w_sn": spectral_norm_weight(convsc_w, ks[8]),
        "convsc_b": convsc_b,
        "hbn0_bias": 0.01 * jax.random.normal(ks[9], (2 * in_channel,), jnp.float32),
        "hbn1_bias": jnp.zeros((2 * out_channel,), jnp.float32),
    }


if __name__ == "__main__":
    key = jax.random.PRNGKey(0)
    kx, kc, kp = jax.random.split(key, 3)

    N, IN_CH, OUT_CH, H, W, N_COND = 2, 4, 8, 16, 16, 148
    x = jax.random.normal(kx, (N, IN_CH, H, W), jnp.float32)      # NCHW like PyTorch
    condition = jax.random.normal(kc, (N, N_COND), jnp.float32)
    params = init_params(kp, IN_CH, OUT_CH)

    y = gblock_forward(params, x, condition)
    y = jax.block_until_ready(y)
    assert y.shape == (N, OUT_CH, 2 * H, 2 * W), y.shape

    # numerical sanity check against the pure-JAX reference
    y_ref = _reference_forward(params, x, condition)
    err = float(jnp.max(jnp.abs(y - y_ref)))
    ref_mag = float(jnp.max(jnp.abs(y_ref)))
    assert err <= 1e-2 * ref_mag + 1e-3, (err, ref_mag)

    print("KERNEL_OK")
</pallas_src>

<mosaic_0001>
module attributes {stable_mosaic.version = 11 : i64} {
  func.func @_bn_stats_kernel(%arg0: i32, %arg1: memref<32x64xf32, #tpu.memory_space<vmem>>, %arg2: memref<2x4xf32, #tpu.memory_space<vmem>>, %arg3: memref<2x64xf32, #tpu.memory_space<vmem>>) attributes {dimension_semantics = [#tpu.dimension_semantics<arbitrary>], iteration_bounds = array<i64: 1>, scalar_prefetch = 0 : i64, scratch_operands = 1 : i64, tpu.core_type = #tpu.core_type<tc>, window_params = [{transform_indices = @transform_0, window_bounds = array<i64: 32, 64>}, {pipeline_mode = #tpu.pipeline_mode<synchronous>, transform_indices = @transform_1, window_bounds = array<i64: 2, 4>}]} {
    %c0_i32 = arith.constant 0 : i32
    %0 = arith.cmpi eq, %arg0, %c0_i32 : i32
    %1 = arith.extui %0 : i1 to i32
    %c0_i32_0 = arith.constant 0 : i32
    %2 = arith.cmpi ne, %1, %c0_i32_0 : i32
    scf.if %2 {
      %cst_12 = arith.constant 0.000000e+00 : f32
      %18 = vector.broadcast %cst_12 : f32 to vector<2x64xf32>
      %c0_13 = arith.constant 0 : index
      %c0_14 = arith.constant 0 : index
      %19 = vector.load %arg3[%c0_13, %c0_14] : memref<2x64xf32, #tpu.memory_space<vmem>>, vector<2x64xf32>
      tpu.vector_store %arg3[%c0_13, %c0_14], %18 {strides = array<i32>} : memref<2x64xf32, #tpu.memory_space<vmem>>, vector<2x64xf32>,
    } else {
    }
    %c0 = arith.constant 0 : index
    %c0_1 = arith.constant 0 : index
    %3 = vector.load %arg1[%c0, %c0_1] : memref<32x64xf32, #tpu.memory_space<vmem>>, vector<32x64xf32>
    %c0_2 = arith.constant 0 : index
    %c0_3 = arith.constant 0 : index
    %4 = vector.load %arg3[%c0_2, %c0_3] : memref<2x64xf32, #tpu.memory_space<vmem>>, vector<1x64xf32>
    %cst = arith.constant dense<0.000000e+00> : vector<64xf32>
    %5 = vector.multi_reduction <add>, %3, %cst [0] : vector<32x64xf32> to vector<64xf32>
    %6 = vector.shape_cast %5 : vector<64xf32> to vector<1x64xf32>
    %7 = arith.addf %4, %6 : vector<1x64xf32>
    %c0_4 = arith.constant 0 : index
    %c0_5 = arith.constant 0 : index
    %8 = vector.load %arg3[%c0_4, %c0_5] : memref<2x64xf32, #tpu.memory_space<vmem>>, vector<1x64xf32>
    tpu.vector_store %arg3[%c0_4, %c0_5], %7 {strides = array<i32>} : memref<2x64xf32, #tpu.memory_space<vmem>>, vector<1x64xf32>,
    %c1 = arith.constant 1 : index
    %c0_6 = arith.constant 0 : index
    %9 = vector.load %arg3[%c1, %c0_6] : memref<2x64xf32, #tpu.memory_space<vmem>>, vector<1x64xf32>
    %10 = arith.mulf %3, %3 : vector<32x64xf32>
    %cst_7 = arith.constant dense<0.000000e+00> : vector<64xf32>
    %11 = vector.multi_reduction <add>, %10, %cst_7 [0] : vector<32x64xf32> to vector<64xf32>
    %12 = vector.shape_cast %11 : vector<64xf32> to vector<1x64xf32>
    %13 = arith.addf %9, %12 : vector<1x64xf32>
    %c1_8 = arith.constant 1 : index
    %c0_9 = arith.constant 0 : index
    %14 = vector.load %arg3[%c1_8, %c0_9] : memref<2x64xf32, #tpu.memory_space<vmem>>, vector<1x64xf32>
    tpu.vector_store %arg3[%c1_8, %c0_9], %13 {strides = array<i32>} : memref<2x64xf32, #tpu.memory_space<vmem>>, vector<1x64xf32>,
    %c0_i32_10 = arith.constant 0 : i32
    %15 = arith.cmpi eq, %arg0, %c0_i32_10 : i32
    %16 = arith.extui %15 : i1 to i32
    %c0_i32_11 = arith.constant 0 : i32
    %17 = arith.cmpi ne, %16, %c0_i32_11 : i32
    scf.if %17 {
      %c0_12 = arith.constant 0 : index
      %c0_13 = arith.constant 0 : index
      %18 = vector.load %arg3[%c0_12, %c0_13] : memref<2x64xf32, #tpu.memory_space<vmem>>, vector<1x4xf32>
      %c1_14 = arith.constant 1 : index
      %c0_15 = arith.constant 0 : index
      %19 = vector.load %arg3[%c1_14, %c0_15] : memref<2x64xf32, #tpu.memory_space<vmem>>, vector<1x4xf32>
      %c0_16 = arith.constant 0 : index
      %c4 = arith.constant 4 : index
      %20 = vector.load %arg3[%c0_16, %c4] : memref<2x64xf32, #tpu.memory_space<vmem>>, vector<1x4xf32>
      %21 = arith.addf %18, %20 : vector<1x4xf32>
      %c1_17 = arith.constant 1 : index
      %c4_18 = arith.constant 4 : index
      %22 = vector.load %arg3[%c1_17, %c4_18] : memref<2x64xf32, #tpu.memory_space<vmem>>, vector<1x4xf32>
      %23 = arith.addf %19, %22 : vector<1x4xf32>
      %c0_19 = arith.constant 0 : index
      %c8 = arith.constant 8 : index
      %24 = vector.load %arg3[%c0_19, %c8] : memref<2x64xf32, #tpu.memory_space<vmem>>, vector<1x4xf32>
      %25 = arith.addf %21, %24 : vector<1x4xf32>
      %c1_20 = arith.constant 1 : index
      %c8_21 = arith.constant 8 : index
      %26 = vector.load %arg3[%c1_20, %c8_21] : memref<2x64xf32, #tpu.memory_space<vmem>>, vector<1x4xf32>
      %27 = arith.addf %23, %26 : vector<1x4xf32>
      %c0_22 = arith.constant 0 : index
      %c12 = arith.constant 12 : index
      %28 = vector.load %arg3[%c0_22, %c12] : memref<2x64xf32, #tpu.memory_space<vmem>>, vector<1x4xf32>
      %29 = arith.addf %25, %28 : vector<1x4xf32>
      %c1_23 = arith.constant 1 : index
      %c12_24 = arith.constant 12 : index
      %30 = vector.load %arg3[%c1_23, %c12_24] : memref<2x64xf32, #tpu.memory_space<vmem>>, vector<1x4xf32>
      %31 = arith.addf %27, %30 : vector<1x4xf32>
      %c0_25 = arith.constant 0 : index
      %c16 = arith.constant 16 : index
      %32 = vector.load %arg3[%c0_25, %c16] : memref<2x64xf32, #tpu.memory_space<vmem>>, vector<1x4xf32>
      %33 = arith.addf %29, %32 : vector<1x4xf32>
      %c1_26 = arith.constant 1 : index
      %c16_27 = arith.constant 16 : index
      %34 = vector.load %arg3[%c1_26, %c16_27] : memref<2x64xf32, #tpu.memory_space<vmem>>, vector<1x4xf32>
      %35 = arith.addf %31, %34 : vector<1x4xf32>
      %c0_28 = arith.constant 0 : index
      %c20 = arith.constant 20 : index
      %36 = vector.load %arg3[%c0_28, %c20] : memref<2x64xf32, #tpu.memory_space<vmem>>, vector<1x4xf32>
      %37 = arith.addf %33, %36 : vector<1x4xf32>
      %c1_29 = arith.constant 1 : index
      %c20_30 = arith.constant 20 : index
      %38 = vector.load %arg3[%c1_29, %c20_30] : memref<2x64xf32, #tpu.memory_space<vmem>>, vector<1x4xf32>
      %39 = arith.addf %35, %38 : vector<1x4xf32>
      %c0_31 = arith.constant 0 : index
      %c24 = arith.constant 24 : index
      %40 = vector.load %arg3[%c0_31, %c24] : memref<2x64xf32, #tpu.memory_space<vmem>>, vector<1x4xf32>
      %41 = arith.addf %37, %40 : vector<1x4xf32>
      %c1_32 = arith.constant 1 : index
      %c24_33 = arith.constant 24 : index
      %42 = vector.load %arg3[%c1_32, %c24_33] : memref<2x64xf32, #tpu.memory_space<vmem>>, vector<1x4xf32>
      %43 = arith.addf %39, %42 : vector<1x4xf32>
      %c0_34 = arith.constant 0 : index
      %c28 = arith.constant 28 : index
      %44 = vector.load %arg3[%c0_34, %c28] : memref<2x64xf32, #tpu.memory_space<vmem>>, vector<1x4xf32>
      %45 = arith.addf %41, %44 : vector<1x4xf32>
      %c1_35 = arith.constant 1 : index
      %c28_36 = arith.constant 28 : index
      %46 = vector.load %arg3[%c1_35, %c28_36] : memref<2x64xf32, #tpu.memory_space<vmem>>, vector<1x4xf32>
      %47 = arith.addf %43, %46 : vector<1x4xf32>
      %c0_37 = arith.constant 0 : index
      %c32 = arith.constant 32 : index
      %48 = vector.load %arg3[%c0_37, %c32] : memref<2x64xf32, #tpu.memory_space<vmem>>, vector<1x4xf32>
      %49 = arith.addf %45, %48 : vector<1x4xf32>
      %c1_38 = arith.constant 1 : index
      %c32_39 = arith.constant 32 : index
      %50 = vector.load %arg3[%c1_38, %c32_39] : memref<2x64xf32, #tpu.memory_space<vmem>>, vector<1x4xf32>
      %51 = arith.addf %47, %50 : vector<1x4xf32>
      %c0_40 = arith.constant 0 : index
      %c36 = arith.constant 36 : index
      %52 = vector.load %arg3[%c0_40, %c36] : memref<2x64xf32, #tpu.memory_space<vmem>>, vector<1x4xf32>
      %53 = arith.addf %49, %52 : vector<1x4xf32>
      %c1_41 = arith.constant 1 : index
      %c36_42 = arith.constant 36 : index
      %54 = vector.load %arg3[%c1_41, %c36_42] : memref<2x64xf32, #tpu.memory_space<vmem>>, vector<1x4xf32>
      %55 = arith.addf %51, %54 : vector<1x4xf32>
      %c0_43 = arith.constant 0 : index
      %c40 = arith.constant 40 : index
      %56 = vector.load %arg3[%c0_43, %c40] : memref<2x64xf32, #tpu.memory_space<vmem>>, vector<1x4xf32>
      %57 = arith.addf %53, %56 : vector<1x4xf32>
      %c1_44 = arith.constant 1 : index
      %c40_45 = arith.constant 40 : index
      %58 = vector.load %arg3[%c1_44, %c40_45] : memref<2x64xf32, #tpu.memory_space<vmem>>, vector<1x4xf32>
      %59 = arith.addf %55, %58 : vector<1x4xf32>
      %c0_46 = arith.constant 0 : index
      %c44 = arith.constant 44 : index
      %60 = vector.load %arg3[%c0_46, %c44] : memref<2x64xf32, #tpu.memory_space<vmem>>, vector<1x4xf32>
      %61 = arith.addf %57, %60 : vector<1x4xf32>
      %c1_47 = arith.constant 1 : index
      %c44_48 = arith.constant 44 : index
      %62 = vector.load %arg3[%c1_47, %c44_48] : memref<2x64xf32, #tpu.memory_space<vmem>>, vector<1x4xf32>
      %63 = arith.addf %59, %62 : vector<1x4xf32>
      %c0_49 = arith.constant 0 : index
      %c48 = arith.constant 48 : index
      %64 = vector.load %arg3[%c0_49, %c48] : memref<2x64xf32, #tpu.memory_space<vmem>>, vector<1x4xf32>
      %65 = arith.addf %61, %64 : vector<1x4xf32>
      %c1_50 = arith.constant 1 : index
      %c48_51 = arith.constant 48 : index
      %66 = vector.load %arg3[%c1_50, %c48_51] : memref<2x64xf32, #tpu.memory_space<vmem>>, vector<1x4xf32>
      %67 = arith.addf %63, %66 : vector<1x4xf32>
      %c0_52 = arith.constant 0 : index
      %c52 = arith.constant 52 : index
      %68 = vector.load %arg3[%c0_52, %c52] : memref<2x64xf32, #tpu.memory_space<vmem>>, vector<1x4xf32>
      %69 = arith.addf %65, %68 : vector<1x4xf32>
      %c1_53 = arith.constant 1 : index
      %c52_54 = arith.constant 52 : index
      %70 = vector.load %arg3[%c1_53, %c52_54] : memref<2x64xf32, #tpu.memory_space<vmem>>, vector<1x4xf32>
      %71 = arith.addf %67, %70 : vector<1x4xf32>
      %c0_55 = arith.constant 0 : index
      %c56 = arith.constant 56 : index
      %72 = vector.load %arg3[%c0_55, %c56] : memref<2x64xf32, #tpu.memory_space<vmem>>, vector<1x4xf32>
      %73 = arith.addf %69, %72 : vector<1x4xf32>
      %c1_56 = arith.constant 1 : index
      %c56_57 = arith.constant 56 : index
      %74 = vector.load %arg3[%c1_56, %c56_57] : memref<2x64xf32, #tpu.memory_space<vmem>>, vector<1x4xf32>
      %75 = arith.addf %71, %74 : vector<1x4xf32>
      %c0_58 = arith.constant 0 : index
      %c60 = arith.constant 60 : index
      %76 = vector.load %arg3[%c0_58, %c60] : memref<2x64xf32, #tpu.memory_space<vmem>>, vector<1x4xf32>
      %77 = arith.addf %73, %76 : vector<1x4xf32>
      %c1_59 = arith.constant 1 : index
      %c60_60 = arith.constant 60 : index
      %78 = vector.load %arg3[%c1_59, %c60_60] : memref<2x64xf32, #tpu.memory_space<vmem>>, vector<1x4xf32>
      %79 = arith.addf %75, %78 : vector<1x4xf32>
      %cst_61 = arith.constant 0.001953125 : f32
      %80 = vector.broadcast %cst_61 : f32 to vector<1x4xf32>
      %81 = arith.mulf %77, %80 : vector<1x4xf32>
      %cst_62 = arith.constant 0.001953125 : f32
      %82 = vector.broadcast %cst_62 : f32 to vector<1x4xf32>
      %83 = arith.mulf %79, %82 : vector<1x4xf32>
      %84 = arith.mulf %81, %81 : vector<1x4xf32>
      %85 = arith.subf %83, %84 : vector<1x4xf32>
      %cst_63 = arith.constant 0.000000e+00 : f32
      %86 = vector.broadcast %cst_63 : f32 to vector<1x4xf32>
      %87 = arith.maximumf %85, %86 : vector<1x4xf32>
      %c0_64 = arith.constant 0 : index
      %c0_65 = arith.constant 0 : index
      %88 = vector.load %arg2[%c0_64, %c0_65] : memref<2x4xf32, #tpu.memory_space<vmem>>, vector<1x4xf32>
      tpu.vector_store %arg2[%c0_64, %c0_65], %81 {strides = array<i32>} : memref<2x4xf32, #tpu.memory_space<vmem>>, vector<1x4xf32>,
      %c1_66 = arith.constant 1 : index
      %c0_67 = arith.constant 0 : index
      %89 = vector.load %arg2[%c1_66, %c0_67] : memref<2x4xf32, #tpu.memory_space<vmem>>, vector<1x4xf32>
      tpu.vector_store %arg2[%c1_66, %c0_67], %87 {strides = array<i32>} : memref<2x4xf32, #tpu.memory_space<vmem>>, vector<1x4xf32>,
    } else {
    }
    return
  }
  func.func @transform_0(%arg0: i32) -> (i32, i32) {
    %c0_i32 = arith.constant 0 : i32
    %c0_i32_0 = arith.constant 0 : i32
    return %arg0, %c0_i32 : i32, i32
  }
  func.func @transform_1(%arg0: i32) -> (i32, i32) {
    %c0_i32 = arith.constant 0 : i32
    %c0_i32_0 = arith.constant 0 : i32
    %c0_i32_1 = arith.constant 0 : i32
    return %c0_i32, %c0_i32_0 : i32, i32
  }
}

</mosaic_0001>

<bundles_post_ra>
// kernel: tpu_custom_call.1
= control target key start
LH: loop header
LB: loop body
LE: loop exit
PB: predicated region body
PF: predicated region fallthrough
CT: control target
= control target key end

     0   :  { %6 = vsyncpa [#allocation4], 0  ;;  %s329_s0 = inlined_call_operand.hbm [shape: f32[32,64], index: 0, kind: input, shape index: {}]   ;;  %s330_s1 = inlined_call_operand.hbm [shape: f32[2,4], index: 1, kind: output, shape index: {}]  }
   0x1   :  { %7 = vsyncpa [#allocation5], 0  ;;  %s285_s6 = smov [#allocation3]  }
   0x2   :  { %s13_s7 = sshll.u32 %s285_s6, 4  ;;  %s14_s7 = int_to_ptr.vmem [resolvable:$true] %s13_s7 }
   0x3   :  { %s249_s8 = scalar_lea.vmem %s14_s7, 512  ;;  %p254_p1 = scmp.lt.s32.totalorder %s14_s7, %s14_s7 }
   0x4   :  { %p250_p0 = scmp.ne.s32.totalorder %s14_s7, %s249_s8  ;;  %p255_p2 = scmp.lt.s32.totalorder %s249_s8, %s249_s8 }
   0x6   :  { %p256_p3 = por %p255_p2, %p254_p1 }
   0x8   :  { %p257_p4 = pnand %p256_p3, %p250_p0 }
   0xa   :  { %260 = shalt.err (!%p257_p4)
}
   0xb   :  { %s286_s9 = smov 128   ;;  %s287_s10 = smov 8  }
   0xc   :  { %19 = dma.hbm_to_vmem [thread:$0]  %s329_s0, 512, %s14_s7, [#allocation4], %s286_s9, %s286_s9, %s287_s10  }
   0xd   :  { %281 = dma.done.wait [#allocation4], 512  }
   0xe   :  { %282 = vsyncadd [#allocation4], 4294966784  ;;  %vm27_vm0 = vcmask 517120   ;;  %v288_v0 = vmov 0.0   ;;  %vm34_vm1 = vcmask 523264   ;;  %v29_v1 = vld [vmem:[#allocation3] sm:$0xff] }
   0xf   :  { %28 = vst.msk [vmem:[#allocation2] sm:$0x3] %vm27_vm0, %v288_v0  ;;  %v30_v2 = vld [vmem:[#allocation3 + $0x8] sm:$0xff]  ;;  %v31_v3 = vld [vmem:[#allocation3 + $0x10] sm:$0xff]  ;;  %v32_v4 = vld [vmem:[#allocation3 + $0x18] sm:$0xff]  ;;  %v35_v5 = vsel %vm34_vm1, %v29_v1, 0.0  ;;  %v52_v8 = vmul.f32 %v29_v1, %v29_v1 }
  0x10   :  { %v36_v6 = vsel %vm34_vm1, %v30_v2, 0.0  ;;  %v38_v7 = vsel %vm34_vm1, %v31_v3, 0.0  ;;  %v53_v10 = vmul.f32 %v30_v2, %v30_v2  ;;  %v54_v11 = vmul.f32 %v31_v3, %v31_v3  ;;  %s289_s0 = smov 120   ;;  %s290_s13 = smov 124  }
  0x11   :  { %v37_v9 = vadd.f32 %v36_v6, %v35_v5  ;;  %v40_v12 = vsel %vm34_vm1, %v32_v4, 0.0  ;;  %v55_v13 = vmul.f32 %v32_v4, %v32_v4  ;;  %v56_v14 = vsel %vm34_vm1, %v52_v8, 0.0  ;;  %s291_s14 = smov 116   ;;  %s292_s15 = smov 112  }
  0x12   :  { %v57_v16 = vsel %vm34_vm1, %v53_v10, 0.0  ;;  %v59_v17 = vsel %vm34_vm1, %v54_v11, 0.0  ;;  %vm49_vm2 = vcmask 516096   ;;  %s293_s16 = smov 108   ;;  %s294_s17 = smov 104   ;;  %vm203_vm3 = vcmask 24576  }
  0x13   :  { %v39_v15 = vadd.f32 %v38_v7, %v37_v9  ;;  %v58_v18 = vadd.f32 %v57_v16, %v56_v14  ;;  %v61_v20 = vsel %vm34_vm1, %v55_v13, 0.0  ;;  %s295_s18 = smov 100   ;;  %s296_s19 = smov 96  }
  0x14   :  { %s297_s20 = smov 92   ;;  %s298_s21 = smov 88  }
  0x15   :  { %v41_v19 = vadd.f32 %v40_v12, %v39_v15  ;;  %v60_v21 = vadd.f32 %v59_v17, %v58_v18  ;;  %s299_s22 = smov 84   ;;  %s300_s23 = smov 80  }
  0x16   :  { %v33_v31 = vld [vmem:[#allocation2] sm:$0x1]  ;;  %v51_v36 = vld [vmem:[#allocation2 + $0x1] sm:$0x1]  ;;  %s301_s24 = smov 76   ;;  %s302_s25 = smov 72  }
  0x17   :  { %v42_v22 = vrot.slane %v41_v19, 4  ;;  %v62_v23 = vadd.f32 %v61_v20, %v60_v21  ;;  %s303_s26 = smov 68   ;;  %s304_s27 = smov [#allocation6]  }
  0x18   :  { %s212_s28 = sshll.u32 %s304_s27, 4  ;;  %s213_s28 = int_to_ptr.vmem [resolvable:$true] %s212_s28 }
  0x19   :  { %v43_v24 = vadd.f32 %v42_v22, %v41_v19  ;;  %v63_v25 = vrot.slane %v62_v23, 4  ;;  %s261_s29 = scalar_lea.vmem %s213_s28, 32  ;;  %p266_p6 = scmp.lt.s32.totalorder %s213_s28, %s213_s28 }
  0x1a   :  { %p262_p5 = scmp.ne.s32.totalorder %s213_s28, %s261_s29  ;;  %p267_p7 = scmp.lt.s32.totalorder %s261_s29, %s261_s29 }
  0x1b   :  { %v44_v26 = vrot.slane %v43_v24, 2  ;;  %v64_v27 = vadd.f32 %v63_v25, %v62_v23 }
  0x1c   :  { %p268_p8 = por %p267_p7, %p266_p6 }
  0x1d   :  { %v45_v28 = vadd.f32 %v44_v26, %v43_v24  ;;  %v65_v29 = vrot.slane %v64_v27, 2 }
  0x1e   :  { %p269_p9 = pnand %p268_p8, %p262_p5 }
  0x1f   :  { %v46_v30 = vrot.slane %v45_v28, 1  ;;  %v66_v32 = vadd.f32 %v65_v29, %v64_v27 }
  0x21   :  { %v47_v33 = vadd.f32 %v46_v30, %v45_v28  ;;  %v67_v34 = vrot.slane %v66_v32, 1 }
  0x23   :  { %v48_v35 = vadd.f32 %v47_v33, %v33_v31  ;;  %v68_v37 = vadd.f32 %v67_v34, %v66_v32 }
  0x25   :  { %50 = vst.msk [vmem:[#allocation2] sm:$0x1] %vm49_vm2, %v48_v35  ;;  %v69_v38 = vadd.f32 %v68_v37, %v51_v36 }
  0x27   :  { %70 = vst.msk [vmem:[#allocation2 + $0x1] sm:$0x1] %vm49_vm2, %v69_v38 }
  0x2c   :  { %v74_v39 = vld [vmem:[#allocation2] sm:$0x1] }
  0x2d   :  { %86 = vrot.lane.b32.xlu1 %v74_v39, %s289_s0  ;;  %77 = vrot.lane.b32.xlu0 %v74_v39, %s290_s13 }
  0x2e   :  { %v75_v40 = vld [vmem:[#allocation2 + $0x1] sm:$0x1] }
  0x31   :  { %90 = vrot.lane.b32.xlu1 %v75_v40, %s289_s0  ;;  %94 = vrot.lane.b32.xlu0 %v74_v39, %s291_s14 }
  0x35   :  { %98 = vrot.lane.b32.xlu1 %v75_v40, %s291_s14  ;;  %102 = vrot.lane.b32.xlu0 %v74_v39, %s292_s15 }
  0x39   :  { %106 = vrot.lane.b32.xlu1 %v75_v40, %s292_s15  ;;  %110 = vrot.lane.b32.xlu0 %v74_v39, %s293_s16 }
  0x3d   :  { %114 = vrot.lane.b32.xlu1 %v75_v40, %s293_s16  ;;  %118 = vrot.lane.b32.xlu0 %v74_v39, %s294_s17 }
  0x41   :  { %122 = vrot.lane.b32.xlu1 %v75_v40, %s294_s17  ;;  %126 = vrot.lane.b32.xlu0 %v74_v39, %s295_s18 }
  0x45   :  { %130 = vrot.lane.b32.xlu1 %v75_v40, %s295_s18  ;;  %134 = vrot.lane.b32.xlu0 %v74_v39, %s296_s19 }
  0x49   :  { %138 = vrot.lane.b32.xlu1 %v75_v40, %s296_s19  ;;  %82 = vrot.lane.b32.xlu0 %v75_v40, %s290_s13 }
  0x4d   :  { %146 = vrot.lane.b32.xlu1 %v75_v40, %s297_s20  ;;  %142 = vrot.lane.b32.xlu0 %v74_v39, %s297_s20 }
  0x51   :  { %154 = vrot.lane.b32.xlu1 %v75_v40, %s298_s21  ;;  %150 = vrot.lane.b32.xlu0 %v74_v39, %s298_s21 }
  0x55   :  { %162 = vrot.lane.b32.xlu1 %v75_v40, %s299_s22  ;;  %158 = vrot.lane.b32.xlu0 %v74_v39, %s299_s22 }
  0x59   :  { %170 = vrot.lane.b32.xlu1 %v75_v40, %s300_s23  ;;  %166 = vrot.lane.b32.xlu0 %v74_v39, %s300_s23 }
  0x5d   :  { %178 = vrot.lane.b32.xlu1 %v75_v40, %s301_s24  ;;  %174 = vrot.lane.b32.xlu0 %v74_v39, %s301_s24 }
  0x61   :  { %186 = vrot.lane.b32.xlu1 %v75_v40, %s302_s25  ;;  %182 = vrot.lane.b32.xlu0 %v74_v39, %s302_s25 }
  0x65   :  { %194 = vrot.lane.b32.xlu1 %v75_v40, %s303_s26  ;;  %190 = vrot.lane.b32.xlu0 %v74_v39, %s303_s26 }
  0x9f   :  { %v87_v41 = vpop.permute.xlu1 %86  ;;  %v78_v42 = vpop.permute.xlu0 %77 }
  0xa0   :  { %v80_v55 = vadd.f32 %v78_v42, %v74_v39 }
  0xa2   :  { %v89_v58 = vadd.f32 %v87_v41, %v80_v55 }
  0xa3   :  { %v91_v43 = vpop.permute.xlu1 %90  ;;  %v95_v44 = vpop.permute.xlu0 %94 }
  0xa4   :  { %v97_v63 = vadd.f32 %v95_v44, %v89_v58 }
  0xa7   :  { %v99_v45 = vpop.permute.xlu1 %98  ;;  %v103_v46 = vpop.permute.xlu0 %102 }
  0xa8   :  { %v105_v1 = vadd.f32 %v103_v46, %v97_v63 }
  0xab   :  { %v107_v47 = vpop.permute.xlu1 %106  ;;  %v111_v48 = vpop.permute.xlu0 %110 }
  0xac   :  { %v113_v5 = vadd.f32 %v111_v48, %v105_v1 }
  0xaf   :  { %v115_v49 = vpop.permute.xlu1 %114  ;;  %v119_v50 = vpop.permute.xlu0 %118 }
  0xb0   :  { %v121_v7 = vadd.f32 %v119_v50, %v113_v5 }
  0xb3   :  { %v123_v51 = vpop.permute.xlu1 %122  ;;  %v127_v52 = vpop.permute.xlu0 %126 }
  0xb4   :  { %v129_v11 = vadd.f32 %v127_v52, %v121_v7 }
  0xb7   :  { %v131_v53 = vpop.permute.xlu1 %130  ;;  %v135_v54 = vpop.permute.xlu0 %134 }
  0xb8   :  { %v137_v13 = vadd.f32 %v135_v54, %v129_v11 }
  0xbb   :  { %v139_v56 = vpop.permute.xlu1 %138  ;;  %v83_v57 = vpop.permute.xlu0 %82 }
  0xbc   :  { %v85_v59 = vadd.f32 %v83_v57, %v75_v40 }
  0xbe   :  { %v93_v60 = vadd.f32 %v91_v43, %v85_v59 }
  0xbf   :  { %v147_v61 = vpop.permute.xlu1 %146  ;;  %v143_v62 = vpop.permute.xlu0 %142 }
  0xc0   :  { %v101_v0 = vadd.f32 %v99_v45, %v93_v60  ;;  %v145_v18 = vadd.f32 %v143_v62, %v137_v13 }
  0xc2   :  { %v109_v2 = vadd.f32 %v107_v47, %v101_v0 }
  0xc3   :  { %v155_v3 = vpop.permute.xlu1 %154  ;;  %v151_v4 = vpop.permute.xlu0 %150 }
  0xc4   :  { %v117_v6 = vadd.f32 %v115_v49, %v109_v2  ;;  %v153_v20 = vadd.f32 %v151_v4, %v145_v18 }
  0xc6   :  { %v125_v8 = vadd.f32 %v123_v51, %v117_v6 }
  0xc7   :  { %v163_v9 = vpop.permute.xlu1 %162  ;;  %v159_v10 = vpop.permute.xlu0 %158 }
  0xc8   :  { %v133_v12 = vadd.f32 %v131_v53, %v125_v8  ;;  %v161_v24 = vadd.f32 %v159_v10, %v153_v20 }
  0xca   :  { %v141_v14 = vadd.f32 %v139_v56, %v133_v12 }
  0xcb   :  { %v171_v15 = vpop.permute.xlu1 %170  ;;  %v167_v16 = vpop.permute.xlu0 %166 }
  0xcc   :  { %v149_v17 = vadd.f32 %v147_v61, %v141_v14  ;;  %v169_v26 = vadd.f32 %v167_v16, %v161_v24 }
  0xce   :  { %v157_v19 = vadd.f32 %v155_v3, %v149_v17 }
  0xcf   :  { %v179_v21 = vpop.permute.xlu1 %178  ;;  %v175_v22 = vpop.permute.xlu0 %174 }
  0xd0   :  { %v165_v23 = vadd.f32 %v163_v9, %v157_v19  ;;  %v177_v30 = vadd.f32 %v175_v22, %v169_v26 }
  0xd2   :  { %v173_v25 = vadd.f32 %v171_v15, %v165_v23 }
  0xd3   :  { %v187_v27 = vpop.permute.xlu1 %186  ;;  %v183_v28 = vpop.permute.xlu0 %182 }
  0xd4   :  { %v181_v29 = vadd.f32 %v179_v21, %v173_v25  ;;  %v185_v32 = vadd.f32 %v183_v28, %v177_v30 }
  0xd6   :  { %v189_v31 = vadd.f32 %v187_v27, %v181_v29 }
  0xd7   :  { %v195_v33 = vpop.permute.xlu1 %194  ;;  %v191_v34 = vpop.permute.xlu0 %190 }
  0xd8   :  { %v197_v35 = vadd.f32 %v195_v33, %v189_v31  ;;  %v193_v36 = vadd.f32 %v191_v34, %v185_v32 }
  0xda   :  { %v198_v37 = vmul.f32 0.001953125, %v193_v36  ;;  %v199_v38 = vmul.f32 0.001953125, %v197_v35 }
  0xdc   :  { %v200_v39 = vmul.f32 %v198_v37, %v198_v37  ;;  %204 = vst.msk [vmem:[#allocation6] sm:$0x1] %vm203_vm3, %v198_v37 }
  0xde   :  { %v201_v40 = vsub.f32 %v199_v38, %v200_v39 }
  0xe0   :  { %v202_v41 = vmax.f32 %v201_v40, 0.0 }
  0xe2   :  { %205 = vst.msk [vmem:[#allocation6 + $0x1] sm:$0x1] %vm203_vm3, %v202_v41 }
  0xe3   :  { %272 = shalt.err (!%p269_p9)
}
  0xe4   :  { %215 = dma.vmem_to_hbm [thread:$0]  %s213_s28, 32, %s330_s1, [#allocation5]  }
  0xe5   :  { %283 = dma.done.wait [#allocation5], 32  }
  0xe6   :  { %284 = vsyncadd [#allocation5], 4294967264 }
  0xe7   :  { %219 = vsyncpa [#allocation4], 1 }
  0xe8   :  { %220 = vsyncpa [#allocation5], 1 }

</bundles_post_ra>
